<compile_context>
chip_gen: v7x
topology: tpu7x:2x2x1
jax: 0.10.0
libtpu: 0.0.40
codegen_flags: <defaults>
</compile_context>

<pallas_src>
import functools
import math

import jax
import jax.numpy as jnp
from jax.experimental import pallas as pl
from jax.experimental.pallas import tpu as pltpu


# ---------------------------------------------------------------------------
# RMSNorm Pallas kernel
# ---------------------------------------------------------------------------
def _rmsnorm_kernel(x_ref, w_ref, o_ref, *, eps):
    # Full f32 compute, one cast at the store (for f32 inputs this matches
    # torch's `_norm(x.float()).type_as(x) * weight` exactly; for bf16 it
    # saves a down/up-cast pair that v5e would otherwise pay in f32 VALU).
    x = x_ref[...].astype(jnp.float32)
    ms = jnp.mean(x * x, axis=-1, keepdims=True)
    inv = jax.lax.rsqrt(ms + eps)
    w = w_ref[...].astype(jnp.float32)
    o_ref[...] = (x * inv * w).astype(o_ref.dtype)


def _vmem_capacity_bytes():
    try:
        return int(pltpu.get_tpu_info().vmem_capacity_bytes)
    except Exception:
        return 64 * 1024 * 1024  # conservative default (v7x per-TC size)


def _round_down8(v):
    return max(8, (int(v) // 8) * 8)


def _choose_row_tile(n, dim, itemsize, tile_budget_bytes):
    # Per grid step footprint ~= double-buffered in + out + f32 temporaries:
    #   bytes/row ~= dim * (2*2*itemsize + 2*4)
    per_row = dim * (4 * itemsize + 8)
    tm = max(1, tile_budget_bytes // per_row)
    tm = _round_down8(tm)
    tm = min(tm, 1024)                       # diminishing returns past ~1k rows
    tm = min(tm, ((n + 7) // 8) * 8)         # never bigger than padded n
    if n >= 16:
        # Keep >= 2 grid steps so v7x can shard the row axis across its 2 TCs.
        tm = min(tm, _round_down8(n // 2))
    return tm


def rmsnorm(x, weight, eps=1e-6):
    """RMSNorm over the last axis of x, scaled by `weight` (shape (dim,))."""
    orig_shape = x.shape
    dim = orig_shape[-1]
    x2 = x.reshape(-1, dim)
    n = x2.shape[0]
    itemsize = jnp.dtype(x.dtype).itemsize

    vmem_cap = _vmem_capacity_bytes()
    vmem_limit = min(int(vmem_cap * 0.75), 96 * 1024 * 1024)
    tile_budget = int(vmem_cap * 0.45)
    tm = _choose_row_tile(n, dim, itemsize, tile_budget)

    # Pad rows up to a tile multiple (padded rows normalize to 0, sliced off
    # below) instead of the old tm=n fallback.
    n_pad = ((n + tm - 1) // tm) * tm
    if n_pad != n:
        x2 = jnp.pad(x2, ((0, n_pad - n), (0, 0)))
    grid = (n_pad // tm,)

    w2 = weight.reshape(1, dim)

    # TODO(synk): for dim < 128 (the toy test below) the output is not
    # lane-dense and lowers to masked stores; real model dims (multiples of
    # 128) take the fast unmasked-store path.
    cost = pl.CostEstimate(
        flops=3 * n_pad * dim,
        transcendentals=n_pad,
        bytes_accessed=2 * n_pad * dim * itemsize + dim * itemsize,
    )

    out = pl.pallas_call(
        functools.partial(_rmsnorm_kernel, eps=eps),
        out_shape=jax.ShapeDtypeStruct((n_pad, dim), x.dtype),
        grid_spec=pltpu.PrefetchScalarGridSpec(
            num_scalar_prefetch=0,
            grid=grid,
            in_specs=[
                pl.BlockSpec((tm, dim), lambda i: (i, 0)),
                pl.BlockSpec((1, dim), lambda i: (0, 0)),
            ],
            out_specs=pl.BlockSpec((tm, dim), lambda i: (i, 0)),
        ),
        compiler_params=pltpu.CompilerParams(
            dimension_semantics=("parallel",),
            vmem_limit_bytes=vmem_limit,
        ),
        cost_estimate=cost,
    )(x2, w2)

    if n_pad != n:
        out = out[:n]
    return out.reshape(orig_shape)


# ---------------------------------------------------------------------------
# Fused scaled-dot-product attention Pallas kernel (one (batch, head) per step)
# ---------------------------------------------------------------------------
def _attn_kernel(q_ref, k_ref, v_ref, o_ref, *, scale, causal):
    q = q_ref[0].astype(jnp.float32)   # (Tq, hd)
    k = k_ref[0].astype(jnp.float32)   # (Tk, hd)
    v = v_ref[0].astype(jnp.float32)   # (Tk, hd)
    s = jax.lax.dot_general(q, k, (((1,), (1,)), ((), ())),
                            preferred_element_type=jnp.float32) * scale
    if causal:
        tq, tk = s.shape
        qi = jax.lax.broadcasted_iota(jnp.int32, (tq, tk), 0)
        ki = jax.lax.broadcasted_iota(jnp.int32, (tq, tk), 1)
        s = jnp.where(ki <= qi, s, -jnp.inf)
    m = jnp.max(s, axis=-1, keepdims=True)
    p = jnp.exp(s - m)
    l = jnp.sum(p, axis=-1, keepdims=True)
    o = jnp.dot(p, v, preferred_element_type=jnp.float32) / l
    o_ref[0] = o.astype(o_ref.dtype)


def attention(q, k, v, *, causal):
    # q: (B, H, Tq, hd); k, v: (B, H, Tk, hd).
    # TODO(synk): full (Tq, Tk) score tile per step is fine for short
    # sequences; long sequences need a KV-tiled flash-attention variant.
    B, H, Tq, hd = q.shape
    Tk = k.shape[2]
    scale = 1.0 / math.sqrt(hd)
    qf = q.reshape(B * H, Tq, hd)
    kf = k.reshape(B * H, Tk, hd)
    vf = v.reshape(B * H, Tk, hd)

    out = pl.pallas_call(
        functools.partial(_attn_kernel, scale=scale, causal=causal),
        out_shape=jax.ShapeDtypeStruct((B * H, Tq, hd), q.dtype),
        grid_spec=pltpu.PrefetchScalarGridSpec(
            num_scalar_prefetch=0,
            grid=(B * H,),
            in_specs=[
                pl.BlockSpec((1, Tq, hd), lambda i: (i, 0, 0)),
                pl.BlockSpec((1, Tk, hd), lambda i: (i, 0, 0)),
                pl.BlockSpec((1, Tk, hd), lambda i: (i, 0, 0)),
            ],
            out_specs=pl.BlockSpec((1, Tq, hd), lambda i: (i, 0, 0)),
        ),
        compiler_params=pltpu.CompilerParams(
            dimension_semantics=("parallel",),
        ),
    )(qf, kf, vf)
    return out.reshape(B, H, Tq, hd)


# ---------------------------------------------------------------------------
# Pure-JAX pieces of the Decoder (RoPE, projections, FFN) + references
# ---------------------------------------------------------------------------
def compute_freqs_cis(embed_dim, max_seq_length, theta=10000.0):
    idx = jnp.arange(0, embed_dim, 2)[: embed_dim // 2].astype(jnp.float32)
    freqs = 1.0 / (theta ** (idx / embed_dim))
    t = jnp.arange(max_seq_length, dtype=jnp.float32)
    freqs = jnp.outer(t, freqs)
    return jnp.cos(freqs), jnp.sin(freqs)


def apply_rotary_emb(x, C, T):
    xf = x.astype(jnp.float32).reshape(*x.shape[:-1], -1, 2)
    xr, xi = xf[..., 0], xf[..., 1]
    cos, sin = compute_freqs_cis(C, 768)
    cos, sin = cos[:T][None], sin[:T][None]
    out_r = xr * cos - xi * sin
    out_i = xr * sin + xi * cos
    out = jnp.stack([out_r, out_i], axis=-1).reshape(x.shape)
    return out.astype(x.dtype)


def _rmsnorm_ref(x, w, eps=1e-6):
    xf = x.astype(jnp.float32)
    out = xf * jax.lax.rsqrt(jnp.mean(xf * xf, axis=-1, keepdims=True) + eps)
    return (out.astype(x.dtype) * w).astype(x.dtype)


def _attention_ref(q, k, v, causal):
    hd = q.shape[-1]
    s = jnp.einsum("bhqd,bhkd->bhqk", q.astype(jnp.float32),
                   k.astype(jnp.float32)) / math.sqrt(hd)
    if causal:
        tq, tk = s.shape[-2:]
        mask = jnp.tril(jnp.ones((tq, tk), dtype=bool))
        s = jnp.where(mask, s, -jnp.inf)
    p = jax.nn.softmax(s, axis=-1)
    return jnp.einsum("bhqk,bhkd->bhqd", p,
                      v.astype(jnp.float32)).astype(q.dtype)


def _mha_core(q, k, v, causal, use_pallas):
    if use_pallas:
        return attention(q, k, v, causal=causal)
    return _attention_ref(q, k, v, causal)


def self_attention(x, p, num_heads, use_pallas):
    B, T, C = x.shape
    qkv = x @ p["c_attn"].T
    q, k, v = jnp.split(qkv, 3, axis=2)
    q = apply_rotary_emb(q, C, T)
    k = apply_rotary_emb(k, C, T)
    hd = C // num_heads
    q = q.reshape(B, T, num_heads, hd).transpose(0, 2, 1, 3)
    k = k.reshape(B, T, num_heads, hd).transpose(0, 2, 1, 3)
    v = v.reshape(B, T, num_heads, hd).transpose(0, 2, 1, 3)
    y = _mha_core(q, k, v, True, use_pallas)
    y = y.transpose(0, 2, 1, 3).reshape(B, T, C)
    return y @ p["c_proj"].T


def cross_attention(x, key_in, value_in, p, num_heads, use_pallas):
    B, Tq, C = x.shape
    Tk = key_in.shape[1]
    q = x @ p["q"].T
    k = key_in @ p["k"].T
    v = value_in @ p["v"].T
    q = apply_rotary_emb(q, C, Tq)
    k = apply_rotary_emb(k, C, Tk)
    hd = C // num_heads
    q = q.reshape(B, Tq, num_heads, hd).transpose(0, 2, 1, 3)
    k = k.reshape(B, Tk, num_heads, hd).transpose(0, 2, 1, 3)
    v = v.reshape(B, Tk, num_heads, hd).transpose(0, 2, 1, 3)
    y = _mha_core(q, k, v, False, use_pallas)
    y = y.transpose(0, 2, 1, 3).reshape(B, Tq, C)
    return y @ p["c_proj"].T


def feed_forward(x, p):
    # Dropout(p=0) in eval -> identity.
    h = jax.nn.silu(x @ p["w1"].T)
    return jax.nn.silu(h @ p["w2"].T)


def decoder_forward(x, features, params, num_heads, eps=1e-6, use_pallas=True):
    if use_pallas:
        norm = lambda t, w: rmsnorm(t, w, eps)
    else:
        norm = lambda t, w: _rmsnorm_ref(t, w, eps)
    x = x + self_attention(norm(x, params["ln1"]), params["mha"],
                           num_heads, use_pallas)
    x = x + cross_attention(norm(x, params["ln2"]), features, features,
                            params["mha2"], num_heads, use_pallas)
    x = x + feed_forward(norm(x, params["ln3"]), params["ff"])
    return x


# ---------------------------------------------------------------------------
if __name__ == "__main__":
    B, T, C, H = 2, 8, 32, 4   # batch=2, seq=8, hidden=32, 4 heads (head_dim=8)
    key = jax.random.PRNGKey(0)
    ks = jax.random.split(key, 10)
    sc = 0.02

    def w(k, shape):
        return sc * jax.random.normal(k, shape, dtype=jnp.float32)

    params = {
        "ln1": jnp.ones((C,), jnp.float32),   # RMSNorm init = ones
        "ln2": jnp.ones((C,), jnp.float32),
        "ln3": jnp.ones((C,), jnp.float32),
        "mha": {"c_attn": w(ks[0], (3 * C, C)), "c_proj": w(ks[1], (C, C))},
        "mha2": {"q": w(ks[2], (C, C)), "k": w(ks[3], (C, C)),
                 "v": w(ks[4], (C, C)), "c_proj": w(ks[5], (C, C))},
        "ff": {"w1": w(ks[6], (2 * C, C)), "w2": w(ks[7], (C, 2 * C))},
    }

    x = jax.random.normal(ks[8], (B, T, C), dtype=jnp.float32)
    features = jax.random.normal(ks[9], (B, T, C), dtype=jnp.float32)

    fwd = jax.jit(functools.partial(decoder_forward, num_heads=H))
    out = jax.block_until_ready(fwd(x, features, params))

    ref = jax.block_until_ready(
        decoder_forward(x, features, params, H, use_pallas=False))

    assert out.shape == x.shape and out.dtype == x.dtype
    assert jnp.allclose(out, ref, atol=1e-4, rtol=1e-4), \
        float(jnp.max(jnp.abs(out - ref)))
    print("KERNEL_OK")
</pallas_src>

<mosaic_0001>
module attributes {stable_mosaic.version = 11 : i64} {
  func.func @_rmsnorm_kernel(%arg0: i32, %arg1: memref<8x32xf32, #tpu.memory_space<vmem>>, %arg2: memref<1x32xf32, #tpu.memory_space<vmem>>, %arg3: memref<8x32xf32, #tpu.memory_space<vmem>>) attributes {dimension_semantics = [#tpu.dimension_semantics<parallel>], iteration_bounds = array<i64: 2>, scalar_prefetch = 0 : i64, scratch_operands = 0 : i64, tpu.core_type = #tpu.core_type<tc>, window_params = [{transform_indices = @transform_0, window_bounds = array<i64: 8, 32>}, {pipeline_mode = #tpu.pipeline_mode<synchronous>, transform_indices = @transform_1, window_bounds = array<i64: 1, 32>}, {transform_indices = @transform_2, window_bounds = array<i64: 8, 32>}]} {
    %c0 = arith.constant 0 : index
    %c0_0 = arith.constant 0 : index
    %0 = vector.load %arg1[%c0, %c0_0] : memref<8x32xf32, #tpu.memory_space<vmem>>, vector<8x32xf32>
    %1 = arith.mulf %0, %0 : vector<8x32xf32>
    %cst = arith.constant dense<0.000000e+00> : vector<8xf32>
    %2 = vector.multi_reduction <add>, %1, %cst [1] : vector<8x32xf32> to vector<8xf32>
    %3 = vector.shape_cast %2 : vector<8xf32> to vector<8x1xf32>
    %cst_1 = arith.constant 3.200000e+01 : f32
    %4 = vector.broadcast %cst_1 : f32 to vector<8x1xf32>
    %5 = arith.divf %3, %4 : vector<8x1xf32>
    %cst_2 = arith.constant 9.99999997E-7 : f32
    %6 = vector.broadcast %cst_2 : f32 to vector<8x1xf32>
    %7 = arith.addf %5, %6 : vector<8x1xf32>
    %8 = math.rsqrt %7 : vector<8x1xf32>
    %c0_3 = arith.constant 0 : index
    %c0_4 = arith.constant 0 : index
    %9 = vector.load %arg2[%c0_3, %c0_4] : memref<1x32xf32, #tpu.memory_space<vmem>>, vector<1x32xf32>
    %10 = vector.broadcast %8 : vector<8x1xf32> to vector<8x32xf32>
    %11 = arith.mulf %0, %10 : vector<8x32xf32>
    %12 = vector.broadcast %9 : vector<1x32xf32> to vector<8x32xf32>
    %13 = arith.mulf %11, %12 : vector<8x32xf32>
    %c0_5 = arith.constant 0 : index
    %c0_6 = arith.constant 0 : index
    %14 = vector.load %arg3[%c0_5, %c0_6] : memref<8x32xf32, #tpu.memory_space<vmem>>, vector<8x32xf32>
    tpu.vector_store %arg3[%c0_5, %c0_6], %13 {strides = array<i32>} : memref<8x32xf32, #tpu.memory_space<vmem>>, vector<8x32xf32>,
    return
  }
  func.func @transform_0(%arg0: i32) -> (i32, i32) {
    %c0_i32 = arith.constant 0 : i32
    %c0_i32_0 = arith.constant 0 : i32
    return %arg0, %c0_i32 : i32, i32
  }
  func.func @transform_1(%arg0: i32) -> (i32, i32) {
    %c0_i32 = arith.constant 0 : i32
    %c0_i32_0 = arith.constant 0 : i32
    %c0_i32_1 = arith.constant 0 : i32
    return %c0_i32, %c0_i32_0 : i32, i32
  }
  func.func @transform_2(%arg0: i32) -> (i32, i32) {
    %c0_i32 = arith.constant 0 : i32
    %c0_i32_0 = arith.constant 0 : i32
    return %arg0, %c0_i32 : i32, i32
  }
}

module attributes {stable_mosaic.version = 11 : i64} {
  func.func @_attn_kernel(%arg0: i32, %arg1: memref<1x8x8xf32, #tpu.memory_space<vmem>>, %arg2: memref<1x8x8xf32, #tpu.memory_space<vmem>>, %arg3: memref<1x8x8xf32, #tpu.memory_space<vmem>>, %arg4: memref<1x8x8xf32, #tpu.memory_space<vmem>>) attributes {dimension_semantics = [#tpu.dimension_semantics<parallel>], iteration_bounds = array<i64: 8>, scalar_prefetch = 0 : i64, scratch_operands = 0 : i64, tpu.core_type = #tpu.core_type<tc>, window_params = [{transform_indices = @transform_0, window_bounds = array<i64: 1, 8, 8>}, {transform_indices = @transform_1, window_bounds = array<i64: 1, 8, 8>}, {transform_indices = @transform_2, window_bounds = array<i64: 1, 8, 8>}, {transform_indices = @transform_3, window_bounds = array<i64: 1, 8, 8>}]} {
    %c0 = arith.constant 0 : index
    %c0_0 = arith.constant 0 : index
    %c0_1 = arith.constant 0 : index
    %0 = vector.load %arg1[%c0, %c0_0, %c0_1] : memref<1x8x8xf32, #tpu.memory_space<vmem>>, vector<1x8x8xf32>
    %1 = vector.shape_cast %0 : vector<1x8x8xf32> to vector<8x8xf32>
    %c0_2 = arith.constant 0 : index
    %c0_3 = arith.constant 0 : index
    %c0_4 = arith.constant 0 : index
    %2 = vector.load %arg2[%c0_2, %c0_3, %c0_4] : memref<1x8x8xf32, #tpu.memory_space<vmem>>, vector<1x8x8xf32>
    %3 = vector.shape_cast %2 : vector<1x8x8xf32> to vector<8x8xf32>
    %c0_5 = arith.constant 0 : index
    %c0_6 = arith.constant 0 : index
    %c0_7 = arith.constant 0 : index
    %4 = vector.load %arg3[%c0_5, %c0_6, %c0_7] : memref<1x8x8xf32, #tpu.memory_space<vmem>>, vector<1x8x8xf32>
    %5 = vector.shape_cast %4 : vector<1x8x8xf32> to vector<8x8xf32>
    %cst = arith.constant dense<0.000000e+00> : vector<8x8xf32>
    %6 = tpu.matmul %1, %3, %cst {dimension_numbers = #tpu.dot_dimension_numbers<[1], [1], [0], [0], [0, 0, 1, 0], [], []>} : vector<8x8xf32>, vector<8x8xf32>, vector<8x8xf32> -> vector<8x8xf32>
    %cst_8 = arith.constant 0.353553385 : f32
    %7 = vector.broadcast %cst_8 : f32 to vector<8x8xf32>
    %8 = arith.mulf %6, %7 : vector<8x8xf32>
    %9 = tpu.iota {dimensions = array<i32: 0>} : vector<8x8xi32>
    %10 = tpu.iota {dimensions = array<i32: 1>} : vector<8x8xi32>
    %11 = arith.cmpi sle, %10, %9 : vector<8x8xi32>
    %cst_9 = arith.constant 0xFF800000 : f32
    %12 = vector.broadcast %cst_9 : f32 to vector<8x8xf32>
    %13 = arith.select %11, %8, %12 : vector<8x8xi1>, vector<8x8xf32>
    %cst_10 = arith.constant dense<0xFF800000> : vector<8xf32>
    %14 = vector.multi_reduction <maximumf>, %13, %cst_10 [1] : vector<8x8xf32> to vector<8xf32>
    %15 = vector.shape_cast %14 : vector<8xf32> to vector<8x1xf32>
    %16 = vector.broadcast %15 : vector<8x1xf32> to vector<8x8xf32>
    %17 = arith.subf %13, %16 : vector<8x8xf32>
    %18 = math.exp %17 : vector<8x8xf32>
    %cst_11 = arith.constant dense<0.000000e+00> : vector<8xf32>
    %19 = vector.multi_reduction <add>, %18, %cst_11 [1] : vector<8x8xf32> to vector<8xf32>
    %20 = vector.shape_cast %19 : vector<8xf32> to vector<8x1xf32>
    %cst_12 = arith.constant dense<0.000000e+00> : vector<8x8xf32>
    %21 = tpu.matmul %18, %5, %cst_12 {dimension_numbers = #tpu.dot_dimension_numbers<[1], [0], [0], [1], [0, 0, 1, 1], [], []>} : vector<8x8xf32>, vector<8x8xf32>, vector<8x8xf32> -> vector<8x8xf32>
    %22 = vector.broadcast %20 : vector<8x1xf32> to vector<8x8xf32>
    %23 = arith.divf %21, %22 : vector<8x8xf32>
    %c0_13 = arith.constant 0 : index
    %c0_14 = arith.constant 0 : index
    %c0_15 = arith.constant 0 : index
    %24 = vector.load %arg4[%c0_13, %c0_14, %c0_15] : memref<1x8x8xf32, #tpu.memory_space<vmem>>, vector<1x8x8xf32>
    %25 = vector.shape_cast %24 : vector<1x8x8xf32> to vector<8x8xf32>
    %26 = vector.shape_cast %23 : vector<8x8xf32> to vector<1x8x8xf32>
    tpu.vector_store %arg4[%c0_13, %c0_14, %c0_15], %26 {strides = array<i32>} : memref<1x8x8xf32, #tpu.memory_space<vmem>>, vector<1x8x8xf32>,
    return
  }
  func.func @transform_0(%arg0: i32) -> (i32, i32, i32) {
    %c0_i32 = arith.constant 0 : i32
    %c0_i32_0 = arith.constant 0 : i32
    %c0_i32_1 = arith.constant 0 : i32
    return %arg0, %c0_i32, %c0_i32_0 : i32, i32, i32
  }
  func.func @transform_1(%arg0: i32) -> (i32, i32, i32) {
    %c0_i32 = arith.constant 0 : i32
    %c0_i32_0 = arith.constant 0 : i32
    %c0_i32_1 = arith.constant 0 : i32
    return %arg0, %c0_i32, %c0_i32_0 : i32, i32, i32
  }
  func.func @transform_2(%arg0: i32) -> (i32, i32, i32) {
    %c0_i32 = arith.constant 0 : i32
    %c0_i32_0 = arith.constant 0 : i32
    %c0_i32_1 = arith.constant 0 : i32
    return %arg0, %c0_i32, %c0_i32_0 : i32, i32, i32
  }
  func.func @transform_3(%arg0: i32) -> (i32, i32, i32) {
    %c0_i32 = arith.constant 0 : i32
    %c0_i32_0 = arith.constant 0 : i32
    %c0_i32_1 = arith.constant 0 : i32
    return %arg0, %c0_i32, %c0_i32_0 : i32, i32, i32
  }
}

module attributes {stable_mosaic.version = 11 : i64} {
  func.func @_attn_kernel(%arg0: i32, %arg1: memref<1x8x8xf32, #tpu.memory_space<vmem>>, %arg2: memref<1x8x8xf32, #tpu.memory_space<vmem>>, %arg3: memref<1x8x8xf32, #tpu.memory_space<vmem>>, %arg4: memref<1x8x8xf32, #tpu.memory_space<vmem>>) attributes {dimension_semantics = [#tpu.dimension_semantics<parallel>], iteration_bounds = array<i64: 8>, scalar_prefetch = 0 : i64, scratch_operands = 0 : i64, tpu.core_type = #tpu.core_type<tc>, window_params = [{transform_indices = @transform_0, window_bounds = array<i64: 1, 8, 8>}, {transform_indices = @transform_1, window_bounds = array<i64: 1, 8, 8>}, {transform_indices = @transform_2, window_bounds = array<i64: 1, 8, 8>}, {transform_indices = @transform_3, window_bounds = array<i64: 1, 8, 8>}]} {
    %c0 = arith.constant 0 : index
    %c0_0 = arith.constant 0 : index
    %c0_1 = arith.constant 0 : index
    %0 = vector.load %arg1[%c0, %c0_0, %c0_1] : memref<1x8x8xf32, #tpu.memory_space<vmem>>, vector<1x8x8xf32>
    %1 = vector.shape_cast %0 : vector<1x8x8xf32> to vector<8x8xf32>
    %c0_2 = arith.constant 0 : index
    %c0_3 = arith.constant 0 : index
    %c0_4 = arith.constant 0 : index
    %2 = vector.load %arg2[%c0_2, %c0_3, %c0_4] : memref<1x8x8xf32, #tpu.memory_space<vmem>>, vector<1x8x8xf32>
    %3 = vector.shape_cast %2 : vector<1x8x8xf32> to vector<8x8xf32>
    %c0_5 = arith.constant 0 : index
    %c0_6 = arith.constant 0 : index
    %c0_7 = arith.constant 0 : index
    %4 = vector.load %arg3[%c0_5, %c0_6, %c0_7] : memref<1x8x8xf32, #tpu.memory_space<vmem>>, vector<1x8x8xf32>
    %5 = vector.shape_cast %4 : vector<1x8x8xf32> to vector<8x8xf32>
    %cst = arith.constant dense<0.000000e+00> : vector<8x8xf32>
    %6 = tpu.matmul %1, %3, %cst {dimension_numbers = #tpu.dot_dimension_numbers<[1], [1], [0], [0], [0, 0, 1, 0], [], []>} : vector<8x8xf32>, vector<8x8xf32>, vector<8x8xf32> -> vector<8x8xf32>
    %cst_8 = arith.constant 0.353553385 : f32
    %7 = vector.broadcast %cst_8 : f32 to vector<8x8xf32>
    %8 = arith.mulf %6, %7 : vector<8x8xf32>
    %cst_9 = arith.constant dense<0xFF800000> : vector<8xf32>
    %9 = vector.multi_reduction <maximumf>, %8, %cst_9 [1] : vector<8x8xf32> to vector<8xf32>
    %10 = vector.shape_cast %9 : vector<8xf32> to vector<8x1xf32>
    %11 = vector.broadcast %10 : vector<8x1xf32> to vector<8x8xf32>
    %12 = arith.subf %8, %11 : vector<8x8xf32>
    %13 = math.exp %12 : vector<8x8xf32>
    %cst_10 = arith.constant dense<0.000000e+00> : vector<8xf32>
    %14 = vector.multi_reduction <add>, %13, %cst_10 [1] : vector<8x8xf32> to vector<8xf32>
    %15 = vector.shape_cast %14 : vector<8xf32> to vector<8x1xf32>
    %cst_11 = arith.constant dense<0.000000e+00> : vector<8x8xf32>
    %16 = tpu.matmul %13, %5, %cst_11 {dimension_numbers = #tpu.dot_dimension_numbers<[1], [0], [0], [1], [0, 0, 1, 1], [], []>} : vector<8x8xf32>, vector<8x8xf32>, vector<8x8xf32> -> vector<8x8xf32>
    %17 = vector.broadcast %15 : vector<8x1xf32> to vector<8x8xf32>
    %18 = arith.divf %16, %17 : vector<8x8xf32>
    %c0_12 = arith.constant 0 : index
    %c0_13 = arith.constant 0 : index
    %c0_14 = arith.constant 0 : index
    %19 = vector.load %arg4[%c0_12, %c0_13, %c0_14] : memref<1x8x8xf32, #tpu.memory_space<vmem>>, vector<1x8x8xf32>
    %20 = vector.shape_cast %19 : vector<1x8x8xf32> to vector<8x8xf32>
    %21 = vector.shape_cast %18 : vector<8x8xf32> to vector<1x8x8xf32>
    tpu.vector_store %arg4[%c0_12, %c0_13, %c0_14], %21 {strides = array<i32>} : memref<1x8x8xf32, #tpu.memory_space<vmem>>, vector<1x8x8xf32>,
    return
  }
  func.func @transform_0(%arg0: i32) -> (i32, i32, i32) {
    %c0_i32 = arith.constant 0 : i32
    %c0_i32_0 = arith.constant 0 : i32
    %c0_i32_1 = arith.constant 0 : i32
    return %arg0, %c0_i32, %c0_i32_0 : i32, i32, i32
  }
  func.func @transform_1(%arg0: i32) -> (i32, i32, i32) {
    %c0_i32 = arith.constant 0 : i32
    %c0_i32_0 = arith.constant 0 : i32
    %c0_i32_1 = arith.constant 0 : i32
    return %arg0, %c0_i32, %c0_i32_0 : i32, i32, i32
  }
  func.func @transform_2(%arg0: i32) -> (i32, i32, i32) {
    %c0_i32 = arith.constant 0 : i32
    %c0_i32_0 = arith.constant 0 : i32
    %c0_i32_1 = arith.constant 0 : i32
    return %arg0, %c0_i32, %c0_i32_0 : i32, i32, i32
  }
  func.func @transform_3(%arg0: i32) -> (i32, i32, i32) {
    %c0_i32 = arith.constant 0 : i32
    %c0_i32_0 = arith.constant 0 : i32
    %c0_i32_1 = arith.constant 0 : i32
    return %arg0, %c0_i32, %c0_i32_0 : i32, i32, i32
  }
}

</mosaic_0001>

<bundles_post_ra>
// kernel: decoder_forward.5
= control target key start
LH: loop header
LB: loop body
LE: loop exit
PB: predicated region body
PF: predicated region fallthrough
CT: control target
= control target key end

     0   :  { %s255_s9 = smov 0   ;;  %s269_s0 = inlined_call_operand.vmem [shape: f32[16,32], index: 0, kind: input, shape index: {}]   ;;  %s270_s1 = inlined_call_operand.vmem [shape: f32[1,32], index: 1, kind: input, shape index: {}]   ;;  %s271_s2 = inlined_call_operand.vmem [shape: f32[16,32], index: 2, kind: output, shape index: {}]  }
   0x1 LB: > { %s212_s10 = sadd.s32 4294967295, %s238_s9   ;;  %p216_p0 = scmp.ge.s32.totalorder %s238_s9, 1  ;;  %s238_s9 = sphi %s255_s9, %s12_s9  }
   0x2   : > { %p111_p1 = scmp.lt.s32.totalorder %s238_s9, 3 }
   0x4   : > { %p112_p2 = pnand %p216_p0, %p111_p1 }
   0x5   : > { %p131_p3 = scmp.lt.s32.totalorder (!%p112_p2), %s212_s10, 1  ;;  %vm141_vm0 = vcmask (!%p112_p2), 261120   ;;  %v219_v7 = vld [vmem:[%s270_s1] ss:$0 sm:$0xff] (!%p112_p2) }
   0x6   : > { %115 = sbr.rel (%p112_p2) target bundleno = 182 (0xb6), region = 28 }
   0xd   : > { %s273_s10 = smov (!%p131_p3, %s212_s10), 1 }
   0xe   : > { %s217_s11 = sshll.u32 %s273_s10, 3 }
   0xf   : > { %s134_s14 = scalar_lea.vmem %s269_s0, %s217_s11  ;;  %s138_s19 = scalar_lea.vmem %s271_s2, %s217_s11 }
  0x10   : > { %v139_v0 = vld [vmem:[%s134_s14] sm:$0xff] }
  0x11   : > { %v140_v1 = vmul.f32 %v139_v0, %v139_v0 }
  0x13   : > { %v142_v2 = vsel %vm141_vm0, %v140_v1, 0.0 }
  0x14   : > { %143 = vadd.xlane.f32.xlu0 %v142_v2 }
  0xa1   : > { %v144_v3 = vpop.xlane.xlu0 %143 }
  0xa2   : > { %v146_v4 = vmul.f32 0.03125, %v144_v3 }
  0xa4   : > { %v147_v5 = vadd.f32 1e-06, %v146_v4 }
  0xa6   : > { %230 = vrsqrt.f32 %v147_v5 }
  0xb0   : > { %v231_v6 = vpop.eup %230 }
  0xb1   : > { %v150_v8 = vmul.f32 %v231_v6, %v139_v0 }
  0xb3   : > { %v157_v9 = vmul.f32 %v219_v7, %v150_v8 }
  0xb5   : > { %158 = vst.msk [vmem:[%s138_s19] sm:$0xff] %vm141_vm0, %v157_v9 }
  0xb6 PF: > { %s12_s9 = sadd.s32 1, %s238_s9  }
  0xb7   : > { %p9_p4 = scmp.ge.s32.totalorder %s12_s9, 4  }
  0xb9   :  { %11 = sbr.rel (!%p9_p4) target bundleno = 1 (0x1), region = 58 }

// kernel: decoder_forward.6
= control target key start
LH: loop header
LB: loop body
LE: loop exit
PB: predicated region body
PF: predicated region fallthrough
CT: control target
= control target key end

     0   :  { %s521_s12 = smov 0   ;;  %s556_s0 = inlined_call_operand.vmem [shape: f32[8,8,8], index: 0, kind: input, shape index: {}]   ;;  %s557_s1 = inlined_call_operand.vmem [shape: f32[8,8,8], index: 1, kind: input, shape index: {}]   ;;  %s558_s2 = inlined_call_operand.vmem [shape: f32[8,8,8], index: 2, kind: input, shape index: {}]   ;;  %s559_s3 = inlined_call_operand.vmem [shape: f32[8,8,8], index: 3, kind: output, shape index: {}]  }
   0x1 LB: > { %s449_s13 = sadd.s32 4294967295, %s497_s12   ;;  %p453_p0 = scmp.ge.s32.totalorder %s497_s12, 1  ;;  %s497_s12 = sphi %s521_s12, %s13_s12  }
   0x2   : > { %p154_p1 = scmp.lt.s32.totalorder %s497_s12, 9 }
   0x4   : > { %p155_p2 = pnand %p453_p0, %p154_p1 }
   0x5   : > { %p184_p3 = scmp.lt.s32.totalorder (!%p155_p2), %s449_s13, 7  ;;  %v499_v0 = vmov (!%p155_p2), 0.0   ;;  %vm500_vm0 = vmmov (!%p155_p2), 0   ;;  %vm203_vm1 = vcmask (!%p155_p2), 64512   ;;  %v281_v3 = vlaneseq (!%p155_p2) }
   0x6   : > { %158 = sbr.rel (%p155_p2) target bundleno = 608 (0x260), region = 32  ;;  %467 = vmatprep.subr.mxu0 (!%p155_p2), %v499_v0  ;;  %469 = vmatprep.mubr.msk.f32.mxu0 (!%p155_p2), %vm500_vm0, %v499_v0 }
   0x7   : > { %472 = vmatprep.subr.mxu1 (!%p155_p2), %v499_v0  ;;  %474 = vmatprep.mubr.msk.f32.mxu1 (!%p155_p2), %vm500_vm0, %v499_v0  ;;  %v282_v4 = vshrl.u32 (!%p155_p2), %v281_v3, 7  ;;  %v284_v5 = vand.u32 (!%p155_p2), 127, %v281_v3 }
   0x9   : > { %vm285_vm2 = vcmp.le.s32.totalorder (!%p155_p2), %v284_v5, %v282_v4 }
   0xd   : > { %s561_s13 = smov (!%p184_p3, %s449_s13), 7 }
   0xe   : > { %s529_s14 = sshll.u32 %s561_s13, 3 }
   0xf   : > { %s191_s17 = scalar_lea.vmem %s557_s1, %s529_s14  ;;  %s187_s20 = scalar_lea.vmem %s556_s0, %s529_s14 }
  0x10   : > { %v201_v1 = vld [vmem:[%s191_s17] sm:$0xff]  ;;  %s195_s23 = scalar_lea.vmem %s558_s2, %s529_s14  ;;  %s199_s26 = scalar_lea.vmem %s559_s3, %s529_s14 }
  0x11   : > { %468 = vmatpush3.xpose.msk.msra.mxu0 %vm203_vm1, %v201_v1  ;;  %v200_v2 = vld [vmem:[%s187_s20] sm:$0xff] }
  0x12   : > { %v202_v11 = vld [vmem:[%s195_s23] sm:$0xff] }
  0x13   : > { %473 = vmatpush3.msra.mxu1 %v202_v11 }
  0x14   : > { %470 = vmatmul.mubr.msk.f32.vlgmr.msra.gmra.mrb[0].mxu0 %vm203_vm1, %v200_v2 }
  0xe7   : > { %v276_v6 = vpop.f32.mrb[0].mxu0 }
  0xe8   : > { %v280_v7 = vmul.f32 0.35355338, %v276_v6  ;;  %v471_v8 = vpop.f32.mrb[1].mxu0 }
  0xea   : > { %v286_v9 = vsel %vm285_vm2, %v280_v7, -inf }
  0xeb   : > { %v287_v10 = vsel %vm203_vm1, %v286_v9, -inf }
  0xec   : > { %288 = vmax.xlane.f32.xlu0 %v287_v10 }
 0x179   : > { %v289_v12 = vpop.xlane.xlu0 %288 }
 0x17a   : > { %v290_v13 = vsub.f32 %v286_v9, %v289_v12 }
 0x17c   : > { %v291_v14 = vmul.f32 1.442695, %v290_v13 }
 0x17e   : > { %487 = vpow2.f32 %v291_v14 }
 0x188   : > { %v488_v15 = vpop.eup %487 }
 0x189   : > { %475 = vmatmul.mubr.msk.f32.vlgmr.msra.gmra.mrb[0].mxu1 %vm203_vm1, %v488_v15  ;;  %v293_v16 = vsel %vm203_vm1, %v488_v15, 0.0 }
 0x18a   : > { %294 = vadd.xlane.f32.xlu0 %v293_v16 }
 0x217   : > { %v295_v17 = vpop.xlane.xlu0 %294 }
 0x218   : > { %489 = vrcp.f32 %v295_v17 }
 0x222   : > { %v490_v18 = vpop.eup %489 }
 0x25c   : > { %v365_v19 = vpop.f32.mrb[0].mxu1 }
 0x25d   : > { %v370_v20 = vmul.f32 %v490_v18, %v365_v19  ;;  %v476_v21 = vpop.f32.mrb[1].mxu1 }
 0x25f   : > { %371 = vst.msk [vmem:[%s199_s26] sm:$0xff] %vm203_vm1, %v370_v20 }
 0x260 PF: > { %s13_s12 = sadd.s32 1, %s497_s12  }
 0x261   : > { %p10_p4 = scmp.ge.s32.totalorder %s13_s12, 10  }
 0x263   :  { %12 = sbr.rel (!%p10_p4) target bundleno = 1 (0x1), region = 68 }

// kernel: decoder_forward.8
= control target key start
LH: loop header
LB: loop body
LE: loop exit
PB: predicated region body
PF: predicated region fallthrough
CT: control target
= control target key end

     0   :  { %s515_s12 = smov 0   ;;  %s550_s0 = inlined_call_operand.vmem [shape: f32[8,8,8], index: 0, kind: input, shape index: {}]   ;;  %s551_s1 = inlined_call_operand.vmem [shape: f32[8,8,8], index: 1, kind: input, shape index: {}]   ;;  %s552_s2 = inlined_call_operand.vmem [shape: f32[8,8,8], index: 2, kind: input, shape index: {}]   ;;  %s553_s3 = inlined_call_operand.vmem [shape: f32[8,8,8], index: 3, kind: output, shape index: {}]  }
   0x1 LB: > { %s443_s13 = sadd.s32 4294967295, %s491_s12   ;;  %p447_p0 = scmp.ge.s32.totalorder %s491_s12, 1  ;;  %s491_s12 = sphi %s515_s12, %s13_s12  }
   0x2   : > { %p154_p1 = scmp.lt.s32.totalorder %s491_s12, 9 }
   0x4   : > { %p155_p2 = pnand %p447_p0, %p154_p1 }
   0x5   : > { %p184_p3 = scmp.lt.s32.totalorder (!%p155_p2), %s443_s13, 7  ;;  %v493_v0 = vmov (!%p155_p2), 0.0   ;;  %vm494_vm0 = vmmov (!%p155_p2), 0   ;;  %vm203_vm1 = vcmask (!%p155_p2), 64512  }
   0x6   : > { %158 = sbr.rel (%p155_p2) target bundleno = 607 (0x25f), region = 32  ;;  %461 = vmatprep.subr.mxu0 (!%p155_p2), %v493_v0  ;;  %463 = vmatprep.mubr.msk.f32.mxu0 (!%p155_p2), %vm494_vm0, %v493_v0 }
   0x7   : > { %466 = vmatprep.subr.mxu1 (!%p155_p2), %v493_v0  ;;  %468 = vmatprep.mubr.msk.f32.mxu1 (!%p155_p2), %vm494_vm0, %v493_v0 }
   0xd   : > { %s555_s13 = smov (!%p184_p3, %s443_s13), 7 }
   0xe   : > { %s523_s14 = sshll.u32 %s555_s13, 3 }
   0xf   : > { %s191_s17 = scalar_lea.vmem %s551_s1, %s523_s14  ;;  %s187_s20 = scalar_lea.vmem %s550_s0, %s523_s14 }
  0x10   : > { %v201_v1 = vld [vmem:[%s191_s17] sm:$0xff]  ;;  %s195_s23 = scalar_lea.vmem %s552_s2, %s523_s14  ;;  %s199_s26 = scalar_lea.vmem %s553_s3, %s523_s14 }
  0x11   : > { %462 = vmatpush3.xpose.msk.msra.mxu0 %vm203_vm1, %v201_v1  ;;  %v200_v2 = vld [vmem:[%s187_s20] sm:$0xff] }
  0x12   : > { %v202_v7 = vld [vmem:[%s195_s23] sm:$0xff] }
  0x13   : > { %467 = vmatpush3.msra.mxu1 %v202_v7 }
  0x14   : > { %464 = vmatmul.mubr.msk.f32.vlgmr.msra.gmra.mrb[0].mxu0 %vm203_vm1, %v200_v2 }
  0xe7   : > { %v276_v3 = vpop.f32.mrb[0].mxu0 }
  0xe8   : > { %v280_v4 = vmul.f32 0.35355338, %v276_v3  ;;  %v465_v5 = vpop.f32.mrb[1].mxu0 }
  0xea   : > { %v281_v6 = vsel %vm203_vm1, %v280_v4, -inf }
  0xeb   : > { %282 = vmax.xlane.f32.xlu0 %v281_v6 }
 0x178   : > { %v283_v8 = vpop.xlane.xlu0 %282 }
 0x179   : > { %v284_v9 = vsub.f32 %v280_v4, %v283_v8 }
 0x17b   : > { %v285_v10 = vmul.f32 1.442695, %v284_v9 }
 0x17d   : > { %481 = vpow2.f32 %v285_v10 }
 0x187   : > { %v482_v11 = vpop.eup %481 }
 0x188   : > { %469 = vmatmul.mubr.msk.f32.vlgmr.msra.gmra.mrb[0].mxu1 %vm203_vm1, %v482_v11  ;;  %v287_v12 = vsel %vm203_vm1, %v482_v11, 0.0 }
 0x189   : > { %288 = vadd.xlane.f32.xlu0 %v287_v12 }
 0x216   : > { %v289_v13 = vpop.xlane.xlu0 %288 }
 0x217   : > { %483 = vrcp.f32 %v289_v13 }
 0x221   : > { %v484_v14 = vpop.eup %483 }
 0x25b   : > { %v359_v15 = vpop.f32.mrb[0].mxu1 }
 0x25c   : > { %v364_v16 = vmul.f32 %v484_v14, %v359_v15  ;;  %v470_v17 = vpop.f32.mrb[1].mxu1 }
 0x25e   : > { %365 = vst.msk [vmem:[%s199_s26] sm:$0xff] %vm203_vm1, %v364_v16 }
 0x25f PF: > { %s13_s12 = sadd.s32 1, %s491_s12  }
 0x260   : > { %p10_p4 = scmp.ge.s32.totalorder %s13_s12, 10  }
 0x262   :  { %12 = sbr.rel (!%p10_p4) target bundleno = 1 (0x1), region = 68 }

</bundles_post_ra>
